<compile_context>
chip_gen: v7x
topology: tpu7x:2x2x1
jax: 0.10.0
libtpu: 0.0.40
codegen_flags: <defaults>
</compile_context>

<pallas_src>
import jax
import jax.numpy as jnp
from jax.experimental import pallas as pl
from jax.experimental.pallas import tpu as pltpu

LANE = 128
SUBLANE = 8
IN_FEATURES = 625
HIDDEN = 256


def _round_up(x, m):
    return (x + m - 1) // m * m


def fused_fcn_kernel(x_ref, w_ref, b_ref, o_ref):
    # x_ref: (TM, K)  w_ref: (K, C_pad)  b_ref: (1, C_pad) f32  o_ref: (TM, C_pad)
    acc = jnp.dot(x_ref[...], w_ref[...], preferred_element_type=jnp.float32)
    o_ref[...] = (acc + b_ref[...]).astype(o_ref.dtype)


def fuse_params(w1, b1, w2, b2, *, compute_dtype=jnp.float32):
    """Fuse Linear -> Dropout(identity, eval) -> Linear into one affine map.

    Weights are (in_features, out_features), i.e. transpose of nn.Linear.weight.
    Call once, reuse across forward calls (hoisted out of the per-call path).
    Returns (w_fused (K, C_pad) in compute_dtype, b_fused (1, C_pad) f32, n_classes).
    """
    # TODO(synk): training-mode dropout needs the unfused two-matmul kernel with
    # a pltpu.prng_seed + pltpu.stateful_bernoulli mask and 1/(1-p) scaling.
    K, H = w1.shape
    C = w2.shape[1]
    c_pad = _round_up(max(C, LANE), LANE)          # lane-dense output slab (>=128 wide)
    w2p = jnp.zeros((H, c_pad), jnp.float32).at[:, :C].set(w2.astype(jnp.float32))
    b2p = jnp.zeros((c_pad,), jnp.float32).at[:C].set(b2.astype(jnp.float32))
    w_fused = jnp.dot(w1.astype(jnp.float32), w2p,
                      preferred_element_type=jnp.float32)
    b_fused = (jnp.dot(b1.astype(jnp.float32), w2p,
                       preferred_element_type=jnp.float32) + b2p).reshape(1, c_pad)
    return w_fused.astype(compute_dtype), b_fused, C


def base_fcn_apply(x_nchw, w_fused, b_fused, n_classes, *,
                   block_m=None, out_dtype=jnp.float32):
    """Run the fused-affine kernel on pre-fused params.  Returns (B, n_classes)."""
    B = x_nchw.shape[0]
    compute_dtype = w_fused.dtype
    K, c_pad = w_fused.shape
    # nn.Flatten (row-major NCHW); single cast at the source, no padded copy of x.
    x_flat = x_nchw.reshape(B, -1).astype(compute_dtype)
    assert x_flat.shape[1] == K, f"BaseFCN expects {K} flattened features"

    in_itemsize = jnp.dtype(compute_dtype).itemsize
    out_itemsize = jnp.dtype(out_dtype).itemsize

    # Batch tile: multiple of 8 sublanes, large enough to amortize per-step
    # overhead; the kernel is HBM-bound so bigger is better until VMEM.
    if block_m is None:
        block_m = 2048 if in_itemsize <= 2 else 1024
    tm = _round_up(min(block_m, _round_up(B, SUBLANE)), SUBLANE)
    # v7x megacore: make sure the "parallel" batch axis has >= 2 grid steps
    # whenever the batch can actually be split across the two TensorCores.
    if B > SUBLANE and pl.cdiv(B, tm) < 2:
        tm = _round_up(pl.cdiv(B, 2), SUBLANE)
    grid = (pl.cdiv(B, tm),)                       # Pallas masks the partial last tile

    # VMEM budget from the actual tile sizes (x/out double-buffered, weights
    # resident), with headroom; never request the full physical VMEM (v7x: 64 MiB).
    vmem_needed = (2 * tm * K * in_itemsize
                   + 2 * tm * c_pad * out_itemsize
                   + 2 * K * c_pad * in_itemsize
                   + 2 * c_pad * 4)
    vmem_limit = min(max(vmem_needed * 5 // 4 + (2 << 20), 16 << 20), 48 << 20)

    cost = pl.CostEstimate(
        flops=2 * B * K * c_pad,
        transcendentals=0,
        bytes_accessed=(x_flat.size * in_itemsize
                        + w_fused.size * in_itemsize
                        + b_fused.size * 4
                        + B * c_pad * out_itemsize))

    out_padded = pl.pallas_call(
        fused_fcn_kernel,
        out_shape=jax.ShapeDtypeStruct((B, c_pad), out_dtype),
        grid=grid,
        in_specs=[
            pl.BlockSpec((tm, K), lambda i: (i, 0)),       # x: tiled over batch, K = full dim
            pl.BlockSpec((K, c_pad), lambda i: (0, 0)),    # fused weight: VMEM-resident
            pl.BlockSpec((1, c_pad), lambda i: (0, 0)),    # fused bias (f32): VMEM-resident
        ],
        out_specs=pl.BlockSpec((tm, c_pad), lambda i: (i, 0)),
        compiler_params=pltpu.CompilerParams(
            dimension_semantics=("parallel",),             # shard batch over TCs (v7x)
            vmem_limit_bytes=int(vmem_limit),
        ),
        cost_estimate=cost,
    )(x_flat, w_fused, b_fused)

    return out_padded[:, :n_classes]


def base_fcn_forward(x_nchw, w1, b1, w2, b2, *, compute_dtype=jnp.float32,
                     block_m=None, out_dtype=jnp.float32):
    """Convenience one-shot forward (fuses params then applies the kernel)."""
    w_fused, b_fused, n_classes = fuse_params(w1, b1, w2, b2,
                                              compute_dtype=compute_dtype)
    return base_fcn_apply(x_nchw, w_fused, b_fused, n_classes,
                          block_m=block_m, out_dtype=out_dtype)


def init_params(key, n_classes):
    """Deterministic init mimicking nn.Linear's uniform(-1/sqrt(fan_in), ...)."""
    k1, k2, k3, k4 = jax.random.split(key, 4)
    lim1 = 1.0 / jnp.sqrt(float(IN_FEATURES))
    lim2 = 1.0 / jnp.sqrt(float(HIDDEN))
    w1 = jax.random.uniform(k1, (IN_FEATURES, HIDDEN), jnp.float32, -lim1, lim1)
    b1 = jax.random.uniform(k2, (HIDDEN,), jnp.float32, -lim1, lim1)
    w2 = jax.random.uniform(k3, (HIDDEN, n_classes), jnp.float32, -lim2, lim2)
    b2 = jax.random.uniform(k4, (n_classes,), jnp.float32, -lim2, lim2)
    return w1, b1, w2, b2


if __name__ == "__main__":
    key = jax.random.PRNGKey(0)
    kx, kp = jax.random.split(key)

    n_classes = 10
    B = 2
    # 625 flattened features -> (B, 1, 25, 25) NCHW input.
    x = jax.random.normal(kx, (B, 1, 25, 25), jnp.float32)
    w1, b1, w2, b2 = init_params(kp, n_classes)

    # Pure-JAX eval-mode reference (Dropout == identity).
    x_flat = x.reshape(B, -1)
    ref = (x_flat @ w1 + b1) @ w2 + b2

    # Hoisted fusion: params fused once, reused for every forward call.
    wf_f32, bf_f32, C = fuse_params(w1, b1, w2, b2, compute_dtype=jnp.float32)
    out_f32 = base_fcn_apply(x, wf_f32, bf_f32, C)
    out_f32 = jax.block_until_ready(out_f32)
    assert out_f32.shape == (B, n_classes)
    assert jnp.allclose(out_f32, ref, atol=5e-4, rtol=5e-4), "f32 mismatch vs reference"

    # bf16 MXU-input path (f32 accumulation + f32 bias add): halves x HBM traffic.
    wf_bf16, bf_bf16, _ = fuse_params(w1, b1, w2, b2, compute_dtype=jnp.bfloat16)
    out_bf16 = base_fcn_apply(x, wf_bf16, bf_bf16, C)
    out_bf16 = jax.block_until_ready(out_bf16)
    assert out_bf16.shape == (B, n_classes)
    assert jnp.allclose(out_bf16, ref, atol=3e-2, rtol=3e-2), "bf16 mismatch vs reference"

    # One-shot convenience wrapper still works.
    out_once = jax.block_until_ready(base_fcn_forward(x, w1, b1, w2, b2))
    assert jnp.allclose(out_once, ref, atol=5e-4, rtol=5e-4)

    print("KERNEL_OK")
</pallas_src>

<mosaic_0001>
module attributes {stable_mosaic.version = 11 : i64} {
  func.func @fused_fcn_kernel(%arg0: i32, %arg1: memref<8x625xf32, #tpu.memory_space<vmem>>, %arg2: memref<625x128xf32, #tpu.memory_space<vmem>>, %arg3: memref<1x128xf32, #tpu.memory_space<vmem>>, %arg4: memref<8x128xf32, #tpu.memory_space<vmem>>) attributes {dimension_semantics = [#tpu.dimension_semantics<parallel>], iteration_bounds = array<i64: 1>, scalar_prefetch = 0 : i64, scratch_operands = 0 : i64, tpu.core_type = #tpu.core_type<tc>, window_params = [{transform_indices = @transform_0, window_bounds = array<i64: 8, 625>}, {pipeline_mode = #tpu.pipeline_mode<synchronous>, transform_indices = @transform_1, window_bounds = array<i64: 625, 128>}, {pipeline_mode = #tpu.pipeline_mode<synchronous>, transform_indices = @transform_2, window_bounds = array<i64: 1, 128>}, {transform_indices = @transform_3, window_bounds = array<i64: 8, 128>}]} {
    %c0 = arith.constant 0 : index
    %c0_0 = arith.constant 0 : index
    %0 = vector.load %arg1[%c0, %c0_0] : memref<8x625xf32, #tpu.memory_space<vmem>>, vector<8x625xf32>
    %c0_1 = arith.constant 0 : index
    %c0_2 = arith.constant 0 : index
    %1 = vector.load %arg2[%c0_1, %c0_2] : memref<625x128xf32, #tpu.memory_space<vmem>>, vector<625x128xf32>
    %cst = arith.constant dense<0.000000e+00> : vector<8x128xf32>
    %2 = tpu.matmul %0, %1, %cst {dimension_numbers = #tpu.dot_dimension_numbers<[1], [0], [0], [1], [0, 0, 1, 1], [], []>} : vector<8x625xf32>, vector<625x128xf32>, vector<8x128xf32> -> vector<8x128xf32>
    %c0_3 = arith.constant 0 : index
    %c0_4 = arith.constant 0 : index
    %3 = vector.load %arg3[%c0_3, %c0_4] : memref<1x128xf32, #tpu.memory_space<vmem>>, vector<1x128xf32>
    %4 = vector.broadcast %3 : vector<1x128xf32> to vector<8x128xf32>
    %5 = arith.addf %2, %4 : vector<8x128xf32>
    %c0_5 = arith.constant 0 : index
    %c0_6 = arith.constant 0 : index
    %6 = vector.load %arg4[%c0_5, %c0_6] : memref<8x128xf32, #tpu.memory_space<vmem>>, vector<8x128xf32>
    tpu.vector_store %arg4[%c0_5, %c0_6], %5 {strides = array<i32>} : memref<8x128xf32, #tpu.memory_space<vmem>>, vector<8x128xf32>,
    return
  }
  func.func @transform_0(%arg0: i32) -> (i32, i32) {
    %c0_i32 = arith.constant 0 : i32
    %c0_i32_0 = arith.constant 0 : i32
    return %arg0, %c0_i32 : i32, i32
  }
  func.func @transform_1(%arg0: i32) -> (i32, i32) {
    %c0_i32 = arith.constant 0 : i32
    %c0_i32_0 = arith.constant 0 : i32
    %c0_i32_1 = arith.constant 0 : i32
    return %c0_i32, %c0_i32_0 : i32, i32
  }
  func.func @transform_2(%arg0: i32) -> (i32, i32) {
    %c0_i32 = arith.constant 0 : i32
    %c0_i32_0 = arith.constant 0 : i32
    %c0_i32_1 = arith.constant 0 : i32
    return %c0_i32, %c0_i32_0 : i32, i32
  }
  func.func @transform_3(%arg0: i32) -> (i32, i32) {
    %c0_i32 = arith.constant 0 : i32
    %c0_i32_0 = arith.constant 0 : i32
    return %arg0, %c0_i32 : i32, i32
  }
}

</mosaic_0001>

<bundles_post_ra>
// kernel: tpu_custom_call.1
= control target key start
LH: loop header
LB: loop body
LE: loop exit
PB: predicated region body
PF: predicated region fallthrough
CT: control target
= control target key end

     0   :  { %8 = vsyncpa [#allocation3], 0  ;;  %s818_s0 = inlined_call_operand.hbm [shape: f32[2,625], index: 0, kind: input, shape index: {}]   ;;  %s819_s1 = inlined_call_operand.hbm [shape: f32[625,128], index: 1, kind: input, shape index: {}]   ;;  %s820_s2 = inlined_call_operand.vmem [shape: f32[1,128], index: 2, kind: input, shape index: {}]   ;;  %s821_s3 = inlined_call_operand.hbm [shape: f32[2,128], index: 3, kind: output, shape index: {}]  }
   0x1   :  { %9 = vsyncpa [#allocation6], 0 }
   0x2   :  { %10 = vsyncpa [#allocation4], 0 }
   0x3   :  { %15 = vsyncadd [#allocation3], 480  ;;  %s738_s12 = smov [#allocation2]   ;;  %s666_s16 = scalar_lea.hbm %s818_s0, 160 }
   0x4   :  { %s16_s13 = sshll.u32 %s738_s12, 4  ;;  %p667_p0 = scmp.ne.s32.totalorder %s818_s0, %s666_s16  ;;  %s17_s13 = int_to_ptr.vmem [resolvable:$true] %s16_s13 }
   0x5   :  { %p670_p1 = scmp.lt.u32.totalorder %s666_s16, %s818_s0 }
   0x7   :  { %p672_p2 = pnand %p670_p1, %p667_p0 }
   0x9   :  { %675 = shalt.err (!%p672_p2)
}
   0xa   :  { %s676_s21 = scalar_lea.vmem %s17_s13, 160  ;;  %s680_s22 = scalar_lea.vmem %s17_s13, 640 }
   0xb   :  { %p677_p3 = scmp.ne.s32.totalorder %s17_s13, %s676_s21  ;;  %p681_p4 = scmp.lt.s32.totalorder %s17_s13, %s17_s13 }
   0xc   :  { %p682_p5 = scmp.lt.s32.totalorder %s680_s22, %s676_s21 }
   0xe   :  { %p683_p6 = por %p682_p5, %p681_p4 }
  0x10   :  { %p684_p7 = pnand %p683_p6, %p677_p3 }
  0x12   :  { %687 = shalt.err (!%p684_p7)
}
  0x13   :  { %s739_s23 = smov 160   ;;  %s740_s24 = smov 10  }
  0x14   :  { %22 = dma.hbm_to_vmem [thread:$0]  %s818_s0, 160, %s17_s13, [#allocation3], %s739_s23, %s739_s23, %s740_s24  }
  0x15   :  { %s741_s27 = smov [#allocation5]   ;;  %s688_s4 = scalar_lea.hbm %s819_s1, 10112 }
  0x16   :  { %s28_s28 = sshll.u32 %s741_s27, 4  ;;  %p689_p8 = scmp.ne.s32.totalorder %s819_s1, %s688_s4  ;;  %s29_s28 = int_to_ptr.vmem [resolvable:$true] %s28_s28 }
  0x17   :  { %p692_p9 = scmp.lt.u32.totalorder %s688_s4, %s819_s1 }
  0x19   :  { %p694_p10 = pnand %p692_p9, %p689_p8 }
  0x1b   :  { %697 = shalt.err (!%p694_p10)
}
  0x1c   :  { %s698_s9 = scalar_lea.vmem %s29_s28, 10112  ;;  %p703_p12 = scmp.lt.s32.totalorder %s29_s28, %s29_s28 }
  0x1d   :  { %p699_p11 = scmp.ne.s32.totalorder %s29_s28, %s698_s9  ;;  %p704_p13 = scmp.lt.s32.totalorder %s698_s9, %s698_s9 }
  0x1f   :  { %p705_p0 = por %p704_p13, %p703_p12 }
  0x21   :  { %p706_p1 = pnand %p705_p0, %p699_p11 }
  0x23   :  { %709 = shalt.err (!%p706_p1)
}
  0x24   :  { %s742_s0 = smov 128   ;;  %s743_s10 = smov 8  }
  0x25   :  { %34 = dma.hbm_to_vmem [thread:$0]  %s819_s1, 10112, %s29_s28, [#allocation6], %s742_s0, %s742_s0, %s743_s10  }
  0x26   :  { %732 = dma.done.wait [#allocation3], 640  }
  0x27   :  { %733 = vsyncadd [#allocation3], 4294966656 }
  0x28   :  { %734 = dma.done.wait [#allocation6], 10112  }
  0x29   :  { %735 = vsyncadd [#allocation6], 4294957184  ;;  %v67_v0 = vld [vmem:[#allocation5 + $0x80] sm:$0xff]  ;;  %v68_v1 = vld [vmem:[#allocation5 + $0x88] sm:$0xff]  ;;  %v744_v51 = vmov 1983009808   ;;  %v152_v53 = vlaneseq }
  0x2a   :  { %v51_v2 = vld [vmem:[#allocation5] sm:$0xff]  ;;  %v560_v3 = vpack.c.bf16 %v68_v1, %v67_v0  ;;  %v52_v4 = vld [vmem:[#allocation5 + $0x8] sm:$0xff]  ;;  %v69_v11 = vld [vmem:[#allocation5 + $0x90] sm:$0xff]  ;;  %v150_v52 = vunpack.c.l.s4 %v744_v51  ;;  %vm746_vm0 = vmmov 0   ;;  %vm205_vm1 = vcmask 1040384  }
  0x2b   :  { %v99_v5 = vld [vmem:[#allocation5 + $0x180] sm:$0xff]  ;;  %v100_v6 = vld [vmem:[#allocation5 + $0x188] sm:$0xff]  ;;  %v562_v7 = vpack.c.bf16 %v52_v4, %v51_v2  ;;  %v70_v13 = vld [vmem:[#allocation5 + $0x98] sm:$0xff]  ;;  %v153_v4 = vshrl.u32 %v152_v53, 7  ;;  %v745_v53 = vmov 0.0|0.0   ;;  %vm202_vm2 = vcmask 924672  }
  0x2c   :  { %v592_v8 = vpack.c.bf16 %v100_v6, %v99_v5  ;;  %v83_v9 = vld [vmem:[#allocation5 + $0x100] sm:$0xff]  ;;  %v84_v10 = vld [vmem:[#allocation5 + $0x108] sm:$0xff]  ;;  %561 = vmatprep.subr.bf16.mxu0 %v560_v3  ;;  %v53_v14 = vld [vmem:[#allocation5 + $0x10] sm:$0xff]  ;;  %v564_v16 = vpack.c.bf16 %v70_v13, %v69_v11  ;;  %v151_v3 = vunpack.c.0.s8 %v150_v52 }
  0x2d   :  { %v594_v12 = vpack.c.bf16 %v84_v10, %v83_v9  ;;  %v54_v15 = vld [vmem:[#allocation5 + $0x18] sm:$0xff]  ;;  %563 = vmatpush3.bf16.msra.mxu0 %v562_v7  ;;  %v101_v18 = vld [vmem:[#allocation5 + $0x190] sm:$0xff]  ;;  %v71_v23 = vld [vmem:[#allocation5 + $0xa0] sm:$0xff] }
  0x2e   :  { %593 = vmatprep.subr.bf16.mxu1 %v592_v8  ;;  %v566_v17 = vpack.c.bf16 %v54_v15, %v53_v14  ;;  %v102_v19 = vld [vmem:[#allocation5 + $0x198] sm:$0xff]  ;;  %v85_v20 = vld [vmem:[#allocation5 + $0x110] sm:$0xff]  ;;  %v72_v24 = vld [vmem:[#allocation5 + $0xa8] sm:$0xff]  ;;  %565 = vmatprep.subr.bf16.mxu0 %v564_v16 }
  0x2f   :  { %595 = vmatpush3.bf16.msra.mxu1 %v594_v12  ;;  %v596_v21 = vpack.c.bf16 %v102_v19, %v101_v18  ;;  %v86_v22 = vld [vmem:[#allocation5 + $0x118] sm:$0xff]  ;;  %v568_v26 = vpack.c.bf16 %v72_v24, %v71_v23  ;;  %v55_v27 = vld [vmem:[#allocation5 + $0x20] sm:$0xff]  ;;  %v56_v28 = vld [vmem:[#allocation5 + $0x28] sm:$0xff] }
  0x30   :  { %v598_v25 = vpack.c.bf16 %v86_v22, %v85_v20  ;;  %v103_v29 = vld [vmem:[#allocation5 + $0x1a0] sm:$0xff]  ;;  %v104_v30 = vld [vmem:[#allocation5 + $0x1a8] sm:$0xff]  ;;  %v570_v33 = vpack.c.bf16 %v56_v28, %v55_v27  ;;  %v73_v35 = vld [vmem:[#allocation5 + $0xb0] sm:$0xff]  ;;  %v795_v22 = vsub.s32 %v151_v3, %v153_v4 }
  0x31   :  { %597 = vmatprep.subr.bf16.mxu1 %v596_v21  ;;  %v87_v31 = vld [vmem:[#allocation5 + $0x120] sm:$0xff]  ;;  %v88_v32 = vld [vmem:[#allocation5 + $0x128] sm:$0xff]  ;;  %567 = vmatpush3.bf16.msra.mxu0 %v566_v17  ;;  %v600_v34 = vpack.c.bf16 %v104_v30, %v103_v29  ;;  %v74_v36 = vld [vmem:[#allocation5 + $0xb8] sm:$0xff] }
  0x32   :  { %v57_v37 = vld [vmem:[#allocation5 + $0x30] sm:$0xff]  ;;  %569 = vmatprep.subr.bf16.mxu0 %v568_v26  ;;  %v602_v38 = vpack.c.bf16 %v88_v32, %v87_v31  ;;  %v572_v39 = vpack.c.bf16 %v74_v36, %v73_v35  ;;  %v58_v40 = vld [vmem:[#allocation5 + $0x38] sm:$0xff]  ;;  %v75_v46 = vld [vmem:[#allocation5 + $0xc0] sm:$0xff] }
  0x33   :  { %599 = vmatpush3.bf16.msra.mxu1 %v598_v25  ;;  %v105_v41 = vld [vmem:[#allocation5 + $0x1b0] sm:$0xff]  ;;  %v106_v42 = vld [vmem:[#allocation5 + $0x1b8] sm:$0xff]  ;;  %v76_v47 = vld [vmem:[#allocation5 + $0xc8] sm:$0xff]  ;;  %v574_v48 = vpack.c.bf16 %v58_v40, %v57_v37 }
  0x34   :  { %601 = vmatprep.subr.bf16.mxu1 %v600_v34  ;;  %v604_v43 = vpack.c.bf16 %v106_v42, %v105_v41  ;;  %v89_v44 = vld [vmem:[#allocation5 + $0x130] sm:$0xff]  ;;  %v90_v45 = vld [vmem:[#allocation5 + $0x138] sm:$0xff]  ;;  %v107_v49 = vld [vmem:[#allocation5 + $0x1c0] sm:$0xff]  ;;  %v576_v55 = vpack.c.bf16 %v76_v47, %v75_v46 }
  0x35   :  { %571 = vmatpush3.bf16.msra.mxu0 %v570_v33  ;;  %v108_v50 = vld [vmem:[#allocation5 + $0x1c8] sm:$0xff]  ;;  %v606_v54 = vpack.c.bf16 %v90_v45, %v89_v44  ;;  %v59_v56 = vld [vmem:[#allocation5 + $0x40] sm:$0xff]  ;;  %v77_v61 = vld [vmem:[#allocation5 + $0xd0] sm:$0xff] }
  0x36   :  { %573 = vmatprep.subr.bf16.mxu0 %v572_v39  ;;  %v60_v57 = vld [vmem:[#allocation5 + $0x48] sm:$0xff]  ;;  %v91_v58 = vld [vmem:[#allocation5 + $0x140] sm:$0xff]  ;;  %v608_v59 = vpack.c.bf16 %v108_v50, %v107_v49  ;;  %v78_v62 = vld [vmem:[#allocation5 + $0xd8] sm:$0xff] }
  0x37   :  { %603 = vmatpush3.bf16.msra.mxu1 %v602_v38  ;;  %v92_v60 = vld [vmem:[#allocation5 + $0x148] sm:$0xff]  ;;  %v109_v63 = vld [vmem:[#allocation5 + $0x1d0] sm:$0xff]  ;;  %v110_v0 = vld [vmem:[#allocation5 + $0x1d8] sm:$0xff]  ;;  %v578_v1 = vpack.c.bf16 %v60_v57, %v59_v56  ;;  %v580_v6 = vpack.c.bf16 %v78_v62, %v77_v61 }
  0x38   :  { %605 = vmatprep.subr.bf16.mxu1 %v604_v43  ;;  %v61_v2 = vld [vmem:[#allocation5 + $0x50] sm:$0xff]  ;;  %v610_v5 = vpack.c.bf16 %v92_v60, %v91_v58  ;;  %v62_v7 = vld [vmem:[#allocation5 + $0x58] sm:$0xff]  ;;  %v612_v10 = vpack.c.bf16 %v110_v0, %v109_v63  ;;  %v79_v11 = vld [vmem:[#allocation5 + $0xe0] sm:$0xff] }
  0x39   :  { %575 = vmatpush3.bf16.msra.mxu0 %v574_v48  ;;  %v93_v8 = vld [vmem:[#allocation5 + $0x150] sm:$0xff]  ;;  %v94_v9 = vld [vmem:[#allocation5 + $0x158] sm:$0xff]  ;;  %v80_v12 = vld [vmem:[#allocation5 + $0xe8] sm:$0xff]  ;;  %v582_v19 = vpack.c.bf16 %v62_v7, %v61_v2 }
  0x3a   :  { %577 = vmatprep.subr.bf16.mxu0 %v576_v55  ;;  %v111_v13 = vld [vmem:[#allocation5 + $0x1e0] sm:$0xff]  ;;  %v64_v15 = vld [vmem:[#allocation5 + $0x68] sm:$0xff]  ;;  %v81_v20 = vld [vmem:[#allocation5 + $0xf0] sm:$0xff]  ;;  %v614_v23 = vpack.c.bf16 %v94_v9, %v93_v8  ;;  %v584_v24 = vpack.c.bf16 %v80_v12, %v79_v11 }
  0x3b   :  { %607 = vmatpush3.bf16.msra.mxu1 %v606_v54  ;;  %v63_v14 = vld [vmem:[#allocation5 + $0x60] sm:$0xff]  ;;  %v112_v16 = vld [vmem:[#allocation5 + $0x1e8] sm:$0xff]  ;;  %v82_v21 = vld [vmem:[#allocation5 + $0xf8] sm:$0xff] }
  0x3c   :  { %609 = vmatprep.subr.bf16.mxu1 %v608_v59  ;;  %v95_v17 = vld [vmem:[#allocation5 + $0x160] sm:$0xff]  ;;  %v96_v18 = vld [vmem:[#allocation5 + $0x168] sm:$0xff]  ;;  %v616_v25 = vpack.c.bf16 %v112_v16, %v111_v13  ;;  %v113_v26 = vld [vmem:[#allocation5 + $0x1f0] sm:$0xff]  ;;  %v586_v32 = vpack.c.bf16 %v64_v15, %v63_v14  ;;  %v588_v36 = vpack.c.bf16 %v82_v21, %v81_v20  ;;  %v747_v59 = vmov 0.0  }
  0x3d   :  { %579 = vmatpush3.bf16.msra.mxu0 %v578_v1  ;;  %v658_v27 = vld [vmem:[#allocation2] ss:$10 sps:$4 sm:$0xff]   ;;  %v662_v30 = vld [vmem:[#allocation2 + $0x4] ss:$10 sps:$4 sm:$0xff]   ;;  %v618_v33 = vpack.c.bf16 %v96_v18, %v95_v17  ;;  %v65_v37 = vld [vmem:[#allocation5 + $0x70] sm:$0xff] }
  0x3e   :  { %581 = vmatprep.subr.bf16.mxu0 %v580_v6  ;;  %v660_v28 = vld [vmem:[#allocation2 + $0x14] ss:$10 sps:$4 sm:$0xff]   ;;  %v663_v31 = vld [vmem:[#allocation2 + $0x18] ss:$10 sps:$4 sm:$0xff]   ;;  %v155_v34 = vrot.slane %v658_v27, %v795_v22  ;;  %v162_v39 = vrot.slane %v662_v30, %v795_v22  ;;  %v115_v47 = vld [vmem:[#allocation5 + $0x200] sm:$0xff] }
  0x3f   :  { %611 = vmatpush3.bf16.msra.mxu1 %v610_v5  ;;  %v114_v29 = vld [vmem:[#allocation5 + $0x1f8] sm:$0xff]  ;;  %v169_v35 = vrot.slane %v660_v28, %v795_v22  ;;  %v176_v40 = vrot.slane %v663_v31, %v795_v22  ;;  %v97_v43 = vld [vmem:[#allocation5 + $0x170] sm:$0xff]  ;;  %v116_v48 = vld [vmem:[#allocation5 + $0x208] sm:$0xff] }
  0x40   :  { %613 = vmatprep.subr.bf16.mxu1 %v612_v10  ;;  %v66_v38 = vld [vmem:[#allocation5 + $0x78] sm:$0xff]  ;;  %v620_v41 = vpack.c.bf16 %v114_v29, %v113_v26  ;;  %v625_v51 = vpack.c.bf16 %v116_v48, %v115_v47  ;;  %v117_v54 = vld [vmem:[#allocation5 + $0x210] sm:$0xff]  ;;  %v119_v57 = vld [vmem:[#allocation5 + $0x220] sm:$0xff] }
  0x41   :  { %583 = vmatpush3.bf16.msra.mxu0 %v582_v19  ;;  %v178_v42 = vcombine.high %v155_v34, %v169_v35  ;;  %v98_v44 = vld [vmem:[#allocation5 + $0x178] sm:$0xff]  ;;  %v180_v45 = vcombine.high %v162_v39, %v176_v40  ;;  %v590_v46 = vpack.c.bf16 %v66_v38, %v65_v37  ;;  %v177_v50 = vcombine.low %v155_v34, %v169_v35  ;;  %v120_v58 = vld [vmem:[#allocation5 + $0x228] sm:$0xff]  ;;  %v121_v61 = vld [vmem:[#allocation5 + $0x230] sm:$0xff] }
  0x42   :  { %585 = vmatprep.subr.bf16.mxu0 %v584_v24  ;;  %v622_v49 = vpack.c.bf16 %v98_v44, %v97_v43  ;;  %v179_v52 = vcombine.low %v162_v39, %v176_v40  ;;  %v118_v55 = vld [vmem:[#allocation5 + $0x218] sm:$0xff]  ;;  %v631_v60 = vpack.c.bf16 %v120_v58, %v119_v57  ;;  %v123_v0 = vld [vmem:[#allocation5 + $0x240] sm:$0xff]  ;;  %v124_v1 = vld [vmem:[#allocation5 + $0x248] sm:$0xff] }
  0x43   :  { %615 = vmatpush3.bf16.msra.mxu1 %v614_v23  ;;  %273 = vmatprep.mubr.f32.mxu0 %v178_v42  ;;  %v628_v56 = vpack.c.bf16 %v118_v55, %v117_v54  ;;  %v122_v62 = vld [vmem:[#allocation5 + $0x238] sm:$0xff]  ;;  %v637_v2 = vpack.c.bf16 %v124_v1, %v123_v0  ;;  %v125_v3 = vld [vmem:[#allocation5 + $0x250] sm:$0xff]  ;;  %v127_v6 = vld [vmem:[#allocation5 + $0x260] sm:$0xff] }
  0x44   :  { %617 = vmatprep.subr.bf16.mxu1 %v616_v25  ;;  %343 = vmatprep.mubr.f32.mxu1 %v180_v45  ;;  %v634_v63 = vpack.c.bf16 %v122_v62, %v121_v61  ;;  %v126_v4 = vld [vmem:[#allocation5 + $0x258] sm:$0xff]  ;;  %v128_v7 = vld [vmem:[#allocation5 + $0x268] sm:$0xff]  ;;  %v129_v13 = vld [vmem:[#allocation5 + $0x270] sm:$0x1] }
  0x45   :  { %587 = vmatpush3.bf16.msra.mxu0 %v586_v32  ;;  %v640_v5 = vpack.c.bf16 %v126_v4, %v125_v3  ;;  %v664_v8 = vld [vmem:[#allocation2 + $0x8] ss:$10 sps:$4 sm:$0x33]   ;;  %v665_v9 = vld [vmem:[#allocation2 + $0x1c] ss:$10 sps:$4 sm:$0x33]   ;;  %v643_v10 = vpack.c.bf16 %v128_v7, %v127_v6 }
  0x46   :  { %589 = vmatprep.subr.bf16.mxu0 %v588_v36  ;;  %v189_v11 = vrot.slane %v664_v8, %v795_v22  ;;  %v196_v12 = vrot.slane %v665_v9, %v795_v22  ;;  %v438_v16 = vld [vmem:[%s820_s2] ss:$0 sm:$0xff] }
  0x47   :  { %619 = vmatpush3.bf16.msra.mxu1 %v618_v33 }
  0x48   :  { %621 = vmatprep.subr.bf16.mxu1 %v620_v41  ;;  %v197_v14 = vcombine.low %v189_v11, %v196_v12 }
  0x49   :  { %591 = vmatpush3.bf16.msra.mxu0 %v590_v46 }
  0x4a   :  { %624 = vmatprep.subr.bf16.mxu0 %v745_v53 }
  0x4b   :  { %623 = vmatpush3.bf16.msra.mxu1 %v622_v49 }
  0x4c   :  { %274 = vmatmul.mubr.f32.vlgmr.msra.gmra.mrb[0].mxu0 %v177_v50 }
  0x4d   :  { %626 = vmatpush3.bf16.msra.mxu0 %v625_v51  ;;  %557 = vmatprep.mubr.msk.f32.mxu0 %vm746_vm0, %v747_v59 }
  0x4e   :  { %344 = vmatmul.mubr.f32.vlgmr.msra.gmra.mrb[0].mxu1 %v179_v52  ;;  %627 = vmatprep.subr.bf16.mxu0 %v745_v53 }
  0x51   :  { %629 = vmatpush3.bf16.msra.mxu0 %v628_v56 }
  0x52   :  { %630 = vmatprep.subr.bf16.mxu0 %v745_v53 }
  0x55   :  { %632 = vmatpush3.bf16.msra.mxu0 %v631_v60 }
  0x56   :  { %633 = vmatprep.subr.bf16.mxu0 %v745_v53 }
  0x59   :  { %635 = vmatpush3.bf16.msra.mxu0 %v634_v63 }
  0x5a   :  { %636 = vmatprep.subr.bf16.mxu0 %v745_v53 }
  0x5d   :  { %638 = vmatpush3.bf16.msra.mxu0 %v637_v2 }
  0x5e   :  { %639 = vmatprep.subr.bf16.mxu0 %v745_v53 }
  0x61   :  { %641 = vmatpush3.bf16.msra.mxu0 %v640_v5 }
  0x62   :  { %642 = vmatprep.subr.bf16.mxu0 %v745_v53 }
  0x65   :  { %644 = vmatpush3.bf16.msra.mxu0 %v643_v10 }
  0x66   :  { %555 = vmatprep.subr.mxu0 %v747_v59 }
  0x69   :  { %556 = vmatpush3.msk.msra.mxu0 %vm205_vm1, %v129_v13 }
  0x6a   :  { %558 = vmatmul.mubr.msk.f32.vlgmr.msra.gmra.mrb[2].mxu0 %vm202_vm2, %v197_v14 }
 0x11f   :  { %v473_v15 = vpop.f32.mrb[0].mxu0 }
 0x120   :  { %v474_v17 = vpop.f32.mrb[1].mxu0 }
 0x121   :  { %v508_v18 = vpop.f32.mrb[0].mxu1  ;;  %v475_v19 = vadd.f32 %v474_v17, %v473_v15 }
 0x122   :  { %v509_v20 = vpop.f32.mrb[1].mxu1 }
 0x123   :  { %v510_v21 = vadd.f32 %v509_v20, %v508_v18  ;;  %v276_v23 = vadd.f32 %v475_v19, %v438_v16 }
 0x125   :  { %v346_v22 = vadd.f32 %v510_v21, %v276_v23 }
 0x13d   :  { %v415_v24 = vpop.f32.mrb[2].mxu0 }
 0x13e   :  { %v416_v25 = vadd.f32 %v415_v24, %v346_v22  ;;  %v559_v26 = vpop.f32.mrb[3].mxu0 }
 0x140   :  { %419 = vst [vmem:[#allocation7] sm:$0xff] %v416_v25 }
 0x141   :  { %424 = vsyncadd [#allocation4], 96  ;;  %s748_s14 = smov [#allocation7]  }
 0x142   :  { %s425_s15 = sshll.u32 %s748_s14, 4  ;;  %s426_s15 = int_to_ptr.vmem [resolvable:$true] %s425_s15 }
 0x143   :  { %s710_s16 = scalar_lea.vmem %s426_s15, 32  ;;  %s714_s17 = scalar_lea.vmem %s426_s15, 128 }
 0x144   :  { %p711_p2 = scmp.ne.s32.totalorder %s426_s15, %s710_s16  ;;  %p715_p3 = scmp.lt.s32.totalorder %s426_s15, %s426_s15 }
 0x145   :  { %p716_p4 = scmp.lt.s32.totalorder %s714_s17, %s710_s16 }
 0x147   :  { %p717_p5 = por %p716_p4, %p715_p3 }
 0x149   :  { %p718_p6 = pnand %p717_p5, %p711_p2 }
 0x14b   :  { %721 = shalt.err (!%p718_p6)
}
 0x14c   :  { %s722_s19 = scalar_lea.hbm %s821_s3, 32 }
 0x14d   :  { %p723_p7 = scmp.ne.s32.totalorder %s821_s3, %s722_s19  ;;  %p726_p8 = scmp.lt.u32.totalorder %s722_s19, %s821_s3 }
 0x14f   :  { %p728_p9 = pnand %p726_p8, %p723_p7 }
 0x151   :  { %731 = shalt.err (!%p728_p9)
}
 0x152   :  { %s749_s24 = smov 32   ;;  %s750_s25 = smov 2  }
 0x153   :  { %431 = dma.vmem_to_hbm [thread:$0]  %s426_s15, 32, %s821_s3, [#allocation4], %s749_s24, %s749_s24, %s750_s25  }
 0x154   :  { %736 = dma.done.wait [#allocation4], 128  }
 0x155   :  { %737 = vsyncadd [#allocation4], 4294967168 }
 0x156   :  { %435 = vsyncpa [#allocation3], 1 }
 0x157   :  { %436 = vsyncpa [#allocation6], 1 }
 0x158   :  { %437 = vsyncpa [#allocation4], 1 }

</bundles_post_ra>
